<compile_context>
chip_gen: v6e
topology: v6e:2x2x1
jax: 0.10.0
libtpu: 0.0.40
codegen_flags: <defaults>
</compile_context>

<pallas_src>
import jax
import jax.numpy as jnp
from jax.experimental import pallas as pl
from jax.experimental.pallas import tpu as pltpu


def _round_up(x, m):
    return (x + m - 1) // m * m


# ---------------------------------------------------------------------------
# Kernels
# ---------------------------------------------------------------------------
def _ffn_accumulate(x_ref, w1_ref, w2_ref, acc_ref):
    """One F-tile step: acc += relu(x @ W1[:, f_tile]) @ W2[f_tile, :]."""
    @pl.when(pl.program_id(1) == 0)
    def _():
        acc_ref[...] = jnp.zeros_like(acc_ref)

    h = jnp.dot(x_ref[...], w1_ref[...], preferred_element_type=jnp.float32)
    h = jnp.maximum(h, 0.0)  # ReLU (elementwise, partitions cleanly over F)
    acc_ref[...] += jnp.dot(h.astype(w2_ref.dtype), w2_ref[...],
                            preferred_element_type=jnp.float32)


def _ffn_kernel_residual(x_ref, res_ref, w1_ref, w2_ref, o_ref, acc_ref):
    _ffn_accumulate(x_ref, w1_ref, w2_ref, acc_ref)

    @pl.when(pl.program_id(1) == pl.num_programs(1) - 1)
    def _():
        o_ref[...] = (res_ref[...].astype(jnp.float32)
                      + acc_ref[...]).astype(o_ref.dtype)


def _ffn_kernel_plain(x_ref, w1_ref, w2_ref, o_ref, acc_ref):
    _ffn_accumulate(x_ref, w1_ref, w2_ref, acc_ref)

    @pl.when(pl.program_id(1) == pl.num_programs(1) - 1)
    def _():
        o_ref[...] = acc_ref[...].astype(o_ref.dtype)


# ---------------------------------------------------------------------------
# Wrapper
# ---------------------------------------------------------------------------
def _choose_tiles(n_tokens, e_pad, f_dim, itemsize,
                  vmem_budget=40 * 1024 * 1024):
    """Pick (TN, TF) so double-buffered tiles fit a v7x-safe VMEM budget."""
    f_r = _round_up(f_dim, 128)
    tf = f_r if f_r <= 1024 else 512

    tn = 512
    while tn > 8:
        need = (2 * 3 * tn * e_pad                 # x, res, out (double-buffered)
                + 2 * 2 * e_pad * tf) * itemsize   # w1, w2 (double-buffered)
        need += tn * e_pad * 4                     # f32 accumulator scratch
        need += 2 * tn * tf * 4                    # headroom for h intermediate
        if need <= vmem_budget:
            break
        tn //= 2
    tn = max(8, min(tn, _round_up(n_tokens, 8)))
    return tn, tf


def ffn_pallas(x, w1, w2, residual=None, add_residual=True):
    """x: [..., E]; w1: [E, F]; w2: [F, E]. Returns same shape/dtype as x."""
    orig_shape = x.shape
    E = orig_shape[-1]
    F = w1.shape[1]
    assert w1.shape == (E, F) and w2.shape == (F, E)

    dtype = x.dtype
    itemsize = jnp.dtype(dtype).itemsize
    x2 = x.reshape(-1, E)
    N = x2.shape[0]

    E_p = _round_up(E, 128)                         # lane-dense feature dim
    TN, TF = _choose_tiles(N, E_p, F, itemsize)
    F_p = _round_up(F, TF)
    N_p = _round_up(N, TN)

    # Zero-padding is semantically inert: relu(0)=0, zero W2 rows add nothing,
    # padded output rows/cols are sliced off below.
    x_p = jnp.zeros((N_p, E_p), dtype).at[:N, :E].set(x2)
    w1_p = jnp.zeros((E_p, F_p), dtype).at[:E, :F].set(w1.astype(dtype))
    w2_p = jnp.zeros((F_p, E_p), dtype).at[:F, :E].set(w2.astype(dtype))

    grid = (N_p // TN, F_p // TF)

    tok_spec = pl.BlockSpec((TN, E_p), lambda n, f: (n, 0))
    w1_spec = pl.BlockSpec((E_p, TF), lambda n, f: (0, f))
    w2_spec = pl.BlockSpec((TF, E_p), lambda n, f: (f, 0))
    out_spec = pl.BlockSpec((TN, E_p), lambda n, f: (n, 0))

    vmem_est = ((2 * 3 * TN * E_p + 2 * (E_p * TF + TF * E_p)) * itemsize
                + TN * E_p * 4 + 2 * TN * TF * 4)
    vmem_limit = int(min(max(2 * vmem_est, 32 * 1024 * 1024),
                         48 * 1024 * 1024))

    compiler_params = pltpu.CompilerParams(
        dimension_semantics=("parallel", "arbitrary"),
        vmem_limit_bytes=vmem_limit,
    )
    scratch = [pltpu.VMEM((TN, E_p), jnp.float32)]
    out_shape = jax.ShapeDtypeStruct((N_p, E_p), dtype)

    if add_residual:
        res2 = (x if residual is None else residual).reshape(-1, E)
        res_p = jnp.zeros((N_p, E_p), dtype).at[:N, :E].set(res2.astype(dtype))
        out_p = pl.pallas_call(
            _ffn_kernel_residual,
            out_shape=out_shape,
            grid=grid,
            in_specs=[tok_spec, tok_spec, w1_spec, w2_spec],
            out_specs=out_spec,
            scratch_shapes=scratch,
            compiler_params=compiler_params,
        )(x_p, res_p, w1_p, w2_p)
    else:
        out_p = pl.pallas_call(
            _ffn_kernel_plain,
            out_shape=out_shape,
            grid=grid,
            in_specs=[tok_spec, w1_spec, w2_spec],
            out_specs=out_spec,
            scratch_shapes=scratch,
            compiler_params=compiler_params,
        )(x_p, w1_p, w2_p)

    return out_p[:N, :E].reshape(orig_shape)


# ---------------------------------------------------------------------------
# Reference + self-test
# ---------------------------------------------------------------------------
def ffn_reference(x, w1, w2, residual=None, add_residual=True):
    h = jnp.maximum(x @ w1, 0.0)
    out = h @ w2
    if not add_residual:
        return out
    if residual is None:
        residual = x
    return residual + out


if __name__ == "__main__":
    # Shapes consistent with FFN(embed_dims=32, feedforward_channels=64), num_fcs=2
    B, S, E, F = 2, 8, 32, 64

    key = jax.random.PRNGKey(0)
    kx, k1, k2 = jax.random.split(key, 3)

    x = jax.random.normal(kx, (B, S, E), dtype=jnp.float32)
    w1 = jax.random.normal(k1, (E, F), dtype=jnp.float32) * (1.0 / jnp.sqrt(E))
    w2 = jax.random.normal(k2, (F, E), dtype=jnp.float32) * (1.0 / jnp.sqrt(F))

    # residual path (residual=None -> residual = x), f32 exactness check
    out = jax.block_until_ready(ffn_pallas(x, w1, w2))
    ref = ffn_reference(x, w1, w2)
    assert out.shape == x.shape and out.dtype == x.dtype
    assert jnp.allclose(out, ref, atol=1e-5, rtol=1e-5)

    # add_residual=False path (previously broken)
    out_nr = jax.block_until_ready(ffn_pallas(x, w1, w2, add_residual=False))
    ref_nr = ffn_reference(x, w1, w2, add_residual=False)
    assert jnp.allclose(out_nr, ref_nr, atol=1e-5, rtol=1e-5)

    # bf16 operands (MXU-rate path on v6e/v7x), looser tolerance
    xb = x.astype(jnp.bfloat16)
    out_b = jax.block_until_ready(ffn_pallas(xb, w1.astype(jnp.bfloat16),
                                             w2.astype(jnp.bfloat16)))
    ref_b = ffn_reference(x, w1, w2)
    assert out_b.dtype == jnp.bfloat16
    assert jnp.allclose(out_b.astype(jnp.float32), ref_b, atol=5e-2, rtol=5e-2)

    print("KERNEL_OK")
</pallas_src>

<mosaic_0001>
module attributes {stable_mosaic.version = 11 : i64} {
  func.func @_ffn_kernel_residual(%arg0: i32, %arg1: i32, %arg2: memref<16x128xf32, #tpu.memory_space<vmem>>, %arg3: memref<16x128xf32, #tpu.memory_space<vmem>>, %arg4: memref<128x128xf32, #tpu.memory_space<vmem>>, %arg5: memref<128x128xf32, #tpu.memory_space<vmem>>, %arg6: memref<16x128xf32, #tpu.memory_space<vmem>>, %arg7: memref<16x128xf32, #tpu.memory_space<vmem>>) attributes {dimension_semantics = [#tpu.dimension_semantics<parallel>, #tpu.dimension_semantics<arbitrary>], iteration_bounds = array<i64: 1, 1>, scalar_prefetch = 0 : i64, scratch_operands = 1 : i64, tpu.core_type = #tpu.core_type<tc>, window_params = [{transform_indices = @transform_0, window_bounds = array<i64: 16, 128>}, {transform_indices = @transform_1, window_bounds = array<i64: 16, 128>}, {transform_indices = @transform_2, window_bounds = array<i64: 128, 128>}, {transform_indices = @transform_3, window_bounds = array<i64: 128, 128>}, {transform_indices = @transform_4, window_bounds = array<i64: 16, 128>}]} {
    %c0_i32 = arith.constant 0 : i32
    %0 = arith.cmpi eq, %arg1, %c0_i32 : i32
    %1 = arith.extui %0 : i1 to i32
    %c0_i32_0 = arith.constant 0 : i32
    %2 = arith.cmpi ne, %1, %c0_i32_0 : i32
    scf.if %2 {
      %cst_14 = arith.constant 0.000000e+00 : f32
      %16 = vector.broadcast %cst_14 : f32 to vector<16x128xf32>
      %c0_15 = arith.constant 0 : index
      %c0_16 = arith.constant 0 : index
      %17 = vector.load %arg7[%c0_15, %c0_16] : memref<16x128xf32, #tpu.memory_space<vmem>>, vector<16x128xf32>
      tpu.vector_store %arg7[%c0_15, %c0_16], %16 {strides = array<i32>} : memref<16x128xf32, #tpu.memory_space<vmem>>, vector<16x128xf32>,
    } else {
    }
    %c0 = arith.constant 0 : index
    %c0_1 = arith.constant 0 : index
    %3 = vector.load %arg2[%c0, %c0_1] : memref<16x128xf32, #tpu.memory_space<vmem>>, vector<16x128xf32>
    %c0_2 = arith.constant 0 : index
    %c0_3 = arith.constant 0 : index
    %4 = vector.load %arg4[%c0_2, %c0_3] : memref<128x128xf32, #tpu.memory_space<vmem>>, vector<128x128xf32>
    %cst = arith.constant dense<0.000000e+00> : vector<16x128xf32>
    %5 = tpu.matmul %3, %4, %cst {dimension_numbers = #tpu.dot_dimension_numbers<[1], [0], [0], [1], [0, 0, 1, 1], [], []>} : vector<16x128xf32>, vector<128x128xf32>, vector<16x128xf32> -> vector<16x128xf32>
    %cst_4 = arith.constant 0.000000e+00 : f32
    %6 = vector.broadcast %cst_4 : f32 to vector<16x128xf32>
    %7 = arith.maximumf %5, %6 : vector<16x128xf32>
    %c0_5 = arith.constant 0 : index
    %c0_6 = arith.constant 0 : index
    %8 = vector.load %arg7[%c0_5, %c0_6] : memref<16x128xf32, #tpu.memory_space<vmem>>, vector<16x128xf32>
    %c0_7 = arith.constant 0 : index
    %c0_8 = arith.constant 0 : index
    %9 = vector.load %arg5[%c0_7, %c0_8] : memref<128x128xf32, #tpu.memory_space<vmem>>, vector<128x128xf32>
    %cst_9 = arith.constant dense<0.000000e+00> : vector<16x128xf32>
    %10 = tpu.matmul %7, %9, %cst_9 {dimension_numbers = #tpu.dot_dimension_numbers<[1], [0], [0], [1], [0, 0, 1, 1], [], []>} : vector<16x128xf32>, vector<128x128xf32>, vector<16x128xf32> -> vector<16x128xf32>
    %11 = arith.addf %8, %10 : vector<16x128xf32>
    %c0_10 = arith.constant 0 : index
    %c0_11 = arith.constant 0 : index
    %12 = vector.load %arg7[%c0_10, %c0_11] : memref<16x128xf32, #tpu.memory_space<vmem>>, vector<16x128xf32>
    tpu.vector_store %arg7[%c0_10, %c0_11], %11 {strides = array<i32>} : memref<16x128xf32, #tpu.memory_space<vmem>>, vector<16x128xf32>,
    %c0_i32_12 = arith.constant 0 : i32
    %13 = arith.cmpi eq, %arg1, %c0_i32_12 : i32
    %14 = arith.extui %13 : i1 to i32
    %c0_i32_13 = arith.constant 0 : i32
    %15 = arith.cmpi ne, %14, %c0_i32_13 : i32
    scf.if %15 {
      %c0_14 = arith.constant 0 : index
      %c0_15 = arith.constant 0 : index
      %16 = vector.load %arg3[%c0_14, %c0_15] : memref<16x128xf32, #tpu.memory_space<vmem>>, vector<16x128xf32>
      %c0_16 = arith.constant 0 : index
      %c0_17 = arith.constant 0 : index
      %17 = vector.load %arg7[%c0_16, %c0_17] : memref<16x128xf32, #tpu.memory_space<vmem>>, vector<16x128xf32>
      %18 = arith.addf %16, %17 : vector<16x128xf32>
      %c0_18 = arith.constant 0 : index
      %c0_19 = arith.constant 0 : index
      %19 = vector.load %arg6[%c0_18, %c0_19] : memref<16x128xf32, #tpu.memory_space<vmem>>, vector<16x128xf32>
      tpu.vector_store %arg6[%c0_18, %c0_19], %18 {strides = array<i32>} : memref<16x128xf32, #tpu.memory_space<vmem>>, vector<16x128xf32>,
    } else {
    }
    return
  }
  func.func @transform_0(%arg0: i32, %arg1: i32) -> (i32, i32) {
    %c0_i32 = arith.constant 0 : i32
    %c0_i32_0 = arith.constant 0 : i32
    return %arg0, %c0_i32 : i32, i32
  }
  func.func @transform_1(%arg0: i32, %arg1: i32) -> (i32, i32) {
    %c0_i32 = arith.constant 0 : i32
    %c0_i32_0 = arith.constant 0 : i32
    return %arg0, %c0_i32 : i32, i32
  }
  func.func @transform_2(%arg0: i32, %arg1: i32) -> (i32, i32) {
    %c0_i32 = arith.constant 0 : i32
    %c0_i32_0 = arith.constant 0 : i32
    return %c0_i32, %arg1 : i32, i32
  }
  func.func @transform_3(%arg0: i32, %arg1: i32) -> (i32, i32) {
    %c0_i32 = arith.constant 0 : i32
    %c0_i32_0 = arith.constant 0 : i32
    return %arg1, %c0_i32 : i32, i32
  }
  func.func @transform_4(%arg0: i32, %arg1: i32) -> (i32, i32) {
    %c0_i32 = arith.constant 0 : i32
    %c0_i32_0 = arith.constant 0 : i32
    return %arg0, %c0_i32 : i32, i32
  }
}

</mosaic_0001>

<bundles_post_ra>
// kernel: tpu_custom_call.1
= control target key start
LH: loop header
LB: loop body
LE: loop exit
PB: predicated region body
PF: predicated region fallthrough
CT: control target
= control target key end

     0   :  { %9 = vsyncpa [#allocation4], 0  ;;  %s584_s0 = inlined_call_operand.hbm [shape: f32[16,128], index: 0, kind: input, shape index: {}]   ;;  %s585_s1 = inlined_call_operand.hbm [shape: f32[16,128], index: 1, kind: input, shape index: {}]   ;;  %s586_s2 = inlined_call_operand.hbm [shape: f32[128,128], index: 2, kind: input, shape index: {}]   ;;  %s587_s3 = inlined_call_operand.hbm [shape: f32[128,128], index: 3, kind: input, shape index: {}]   ;;  %s588_s4 = inlined_call_operand.hbm [shape: f32[16,128], index: 4, kind: output, shape index: {}]  }
   0x1   :  { %10 = vsyncpa [#allocation7], 0 }
   0x2   :  { %11 = vsyncpa [#allocation10], 0 }
   0x3   :  { %12 = vsyncpa [#allocation5], 0  ;;  %s522_s15 = smov [#allocation6]   ;;  %s523_s17 = smov [#allocation3]  }
   0x4   :  { %s30_s16 = sshll.u32 %s522_s15, 4  ;;  %s18_s18 = sshll.u32 %s523_s17, 4  ;;  %s31_s16 = int_to_ptr.vmem [resolvable:$true] %s30_s16  ;;  %s19_s18 = int_to_ptr.vmem [resolvable:$true] %s18_s18 }
   0x5   :  { %s422_s19 = scalar_lea.vmem %s31_s16, 256  ;;  %p427_p1 = scmp.lt.s32.totalorder %s31_s16, %s31_s16 }
   0x6   :  { %p423_p0 = scmp.ne.s32.totalorder %s31_s16, %s422_s19  ;;  %p428_p2 = scmp.lt.s32.totalorder %s422_s19, %s422_s19 }
   0x8   :  { %p429_p3 = por %p428_p2, %p427_p1 }
   0xa   :  { %p430_p4 = pnand %p429_p3, %p423_p0 }
   0xc   :  { %433 = shalt.err (!%p430_p4)
}
   0xd   :  { %s524_s20 = smov 128   ;;  %s525_s21 = smov 8  }
   0xe   :  { %36 = dma.hbm_to_vmem [thread:$0]  %s585_s1, 256, %s31_s16, [#allocation7], %s524_s20, %s524_s20, %s525_s21  }
   0xf   :  { %s442_s24 = scalar_lea.vmem %s19_s18, 256  ;;  %p447_p6 = scmp.lt.s32.totalorder %s19_s18, %s19_s18 }
  0x10   :  { %p443_p5 = scmp.ne.s32.totalorder %s19_s18, %s442_s24  ;;  %p448_p7 = scmp.lt.s32.totalorder %s442_s24, %s442_s24 }
  0x12   :  { %p449_p8 = por %p448_p7, %p447_p6 }
  0x14   :  { %p450_p9 = pnand %p449_p8, %p443_p5 }
  0x16   :  { %453 = shalt.err (!%p450_p9)
}
  0x17   :  { %24 = dma.hbm_to_vmem [thread:$0]  %s584_s0, 256, %s19_s18, [#allocation4], %s524_s20, %s524_s20, %s525_s21  }
  0x18   :  { %s526_s27 = smov [#allocation8]   ;;  %s527_s29 = smov [#allocation9]  }
  0x19   :  { %s42_s28 = sshll.u32 %s526_s27, 4  ;;  %s54_s30 = sshll.u32 %s527_s29, 4  ;;  %s43_s28 = int_to_ptr.vmem [resolvable:$true] %s42_s28  ;;  %s55_s30 = int_to_ptr.vmem [resolvable:$true] %s54_s30 }
  0x1a   :  { %s462_s1 = scalar_lea.vmem %s43_s28, 2048  ;;  %p467_p11 = scmp.lt.s32.totalorder %s43_s28, %s43_s28 }
  0x1b   :  { %p463_p10 = scmp.ne.s32.totalorder %s43_s28, %s462_s1  ;;  %p468_p12 = scmp.lt.s32.totalorder %s462_s1, %s462_s1 }
  0x1d   :  { %p469_p13 = por %p468_p12, %p467_p11 }
  0x1f   :  { %p470_p0 = pnand %p469_p13, %p463_p10 }
  0x21   :  { %473 = shalt.err (!%p470_p0)
}
  0x22   :  { %48 = dma.hbm_to_vmem [thread:$0]  %s586_s2, 2048, %s43_s28, [#allocation7], %s524_s20, %s524_s20, %s525_s21  }
  0x23   :  { %s482_s0 = scalar_lea.vmem %s55_s30, 2048  ;;  %p487_p2 = scmp.lt.s32.totalorder %s55_s30, %s55_s30 }
  0x24   :  { %p483_p1 = scmp.ne.s32.totalorder %s55_s30, %s482_s0  ;;  %p488_p3 = scmp.lt.s32.totalorder %s482_s0, %s482_s0 }
  0x26   :  { %p489_p4 = por %p488_p3, %p487_p2 }
  0x28   :  { %p490_p5 = pnand %p489_p4, %p483_p1 }
  0x2a   :  { %493 = shalt.err (!%p490_p5)
}
  0x2b   :  { %60 = dma.hbm_to_vmem [thread:$0]  %s587_s3, 2048, %s55_s30, [#allocation10], %s524_s20, %s524_s20, %s525_s21  }
  0x2c   :  { %514 = dma.done.wait [#allocation4], 256  }
  0x2d   :  { %515 = vsyncadd [#allocation4], 4294967040 }
  0x2e   :  { %516 = dma.done.wait [#allocation7], 2304  }
  0x2f   :  { %517 = vsyncadd [#allocation7], 4294964992 }
  0x30   :  { %518 = dma.done.wait [#allocation10], 2048  }
  0x31   :  { %519 = vsyncadd [#allocation10], 4294965248  ;;  %v96_v0 = vld [vmem:[#allocation8 + $0x78] sm:$0xff]  ;;  %v95_v1 = vld [vmem:[#allocation8 + $0x70] sm:$0xff]  ;;  %s528_s2 = smov [#allocation11]  }
  0x32   :  { %337 = vmatprep.subr.mxu0 %v96_v0  ;;  %v94_v2 = vld [vmem:[#allocation8 + $0x68] sm:$0xff]  ;;  %v93_v3 = vld [vmem:[#allocation8 + $0x60] sm:$0xff]  ;;  %v92_v5 = vld [vmem:[#allocation8 + $0x58] sm:$0xff]  ;;  %s287_s3 = sshll.u32 %s528_s2, 4  ;;  %s288_s3 = int_to_ptr.vmem [resolvable:$true] %s287_s3 }
  0x33   :  { %338 = vmatpush3.msra.mxu0 %v96_v0  ;;  %v79_v4 = vld [vmem:[#allocation3] sm:$0xff]  ;;  %v191_v6 = vld [vmem:[#allocation9 + $0x78] sm:$0xff]  ;;  %v190_v7 = vld [vmem:[#allocation9 + $0x70] sm:$0xff]  ;;  %s494_s9 = scalar_lea.vmem %s288_s3, 256  ;;  %p499_p7 = scmp.lt.s32.totalorder %s288_s3, %s288_s3 }
  0x34   :  { %339 = vmatprep.subr.mxu0 %v95_v1  ;;  %369 = vmatprep.mubr.f32.mxu0 %v79_v4  ;;  %v91_v8 = vld [vmem:[#allocation8 + $0x50] sm:$0xff]  ;;  %v189_v9 = vld [vmem:[#allocation9 + $0x68] sm:$0xff]  ;;  %v188_v11 = vld [vmem:[#allocation9 + $0x60] sm:$0xff]  ;;  %p495_p6 = scmp.ne.s32.totalorder %s288_s3, %s494_s9  ;;  %p500_p8 = scmp.lt.s32.totalorder %s494_s9, %s494_s9 }
  0x35   :  { %340 = vmatpush3.msra.mxu0 %v95_v1  ;;  %372 = vmatprep.subr.mxu1 %v191_v6  ;;  %v90_v10 = vld [vmem:[#allocation8 + $0x48] sm:$0xff]  ;;  %v89_v12 = vld [vmem:[#allocation8 + $0x40] sm:$0xff]  ;;  %v187_v13 = vld [vmem:[#allocation9 + $0x58] sm:$0xff] }
  0x36   :  { %341 = vmatprep.subr.mxu0 %v94_v2  ;;  %373 = vmatpush3.msra.mxu1 %v191_v6  ;;  %v88_v14 = vld [vmem:[#allocation8 + $0x38] sm:$0xff]  ;;  %v186_v15 = vld [vmem:[#allocation9 + $0x50] sm:$0xff]  ;;  %v185_v17 = vld [vmem:[#allocation9 + $0x48] sm:$0xff]  ;;  %p501_p9 = por %p500_p8, %p499_p7 }
  0x37   :  { %342 = vmatpush3.msra.mxu0 %v94_v2  ;;  %374 = vmatprep.subr.mxu1 %v190_v7  ;;  %v87_v16 = vld [vmem:[#allocation8 + $0x30] sm:$0xff]  ;;  %v86_v18 = vld [vmem:[#allocation8 + $0x28] sm:$0xff]  ;;  %v184_v19 = vld [vmem:[#allocation9 + $0x40] sm:$0xff] }
  0x38   :  { %343 = vmatprep.subr.mxu0 %v93_v3  ;;  %375 = vmatpush3.msra.mxu1 %v190_v7  ;;  %v85_v20 = vld [vmem:[#allocation8 + $0x20] sm:$0xff]  ;;  %v183_v21 = vld [vmem:[#allocation9 + $0x38] sm:$0xff]  ;;  %v182_v23 = vld [vmem:[#allocation9 + $0x30] sm:$0xff]  ;;  %p502_p10 = pnand %p501_p9, %p495_p6 }
  0x39   :  { %344 = vmatpush3.msra.mxu0 %v93_v3  ;;  %376 = vmatprep.subr.mxu1 %v189_v9  ;;  %v84_v22 = vld [vmem:[#allocation8 + $0x18] sm:$0xff]  ;;  %v83_v24 = vld [vmem:[#allocation8 + $0x10] sm:$0xff]  ;;  %v181_v25 = vld [vmem:[#allocation9 + $0x28] sm:$0xff] }
  0x3a   :  { %345 = vmatprep.subr.mxu0 %v92_v5  ;;  %377 = vmatpush3.msra.mxu1 %v189_v9  ;;  %v82_v26 = vld [vmem:[#allocation8 + $0x8] sm:$0xff]  ;;  %v180_v27 = vld [vmem:[#allocation9 + $0x20] sm:$0xff]  ;;  %v179_v29 = vld [vmem:[#allocation9 + $0x18] sm:$0xff] }
  0x3b   :  { %346 = vmatpush3.msra.mxu0 %v92_v5  ;;  %378 = vmatprep.subr.mxu1 %v188_v11  ;;  %v81_v28 = vld [vmem:[#allocation8] sm:$0xff]  ;;  %v80_v30 = vld [vmem:[#allocation3 + $0x8] sm:$0xff]  ;;  %v178_v31 = vld [vmem:[#allocation9 + $0x10] sm:$0xff] }
  0x3c   :  { %347 = vmatprep.subr.mxu0 %v91_v8  ;;  %379 = vmatpush3.msra.mxu1 %v188_v11  ;;  %v177_v32 = vld [vmem:[#allocation9 + $0x8] sm:$0xff]  ;;  %v176_v33 = vld [vmem:[#allocation9] sm:$0xff]  ;;  %v275_v38 = vld [vmem:[#allocation6 + $0x8] sm:$0xff] }
  0x3d   :  { %348 = vmatpush3.msra.mxu0 %v91_v8  ;;  %380 = vmatprep.subr.mxu1 %v187_v13  ;;  %v274_v40 = vld [vmem:[#allocation6] sm:$0xff] }
  0x3e   :  { %349 = vmatprep.subr.mxu0 %v90_v10  ;;  %381 = vmatpush3.msra.mxu1 %v187_v13 }
  0x3f   :  { %350 = vmatpush3.msra.mxu0 %v90_v10  ;;  %382 = vmatprep.subr.mxu1 %v186_v15 }
  0x40   :  { %351 = vmatprep.subr.mxu0 %v89_v12  ;;  %383 = vmatpush3.msra.mxu1 %v186_v15 }
  0x41   :  { %352 = vmatpush3.msra.mxu0 %v89_v12  ;;  %384 = vmatprep.subr.mxu1 %v185_v17 }
  0x42   :  { %353 = vmatprep.subr.mxu0 %v88_v14  ;;  %385 = vmatpush3.msra.mxu1 %v185_v17 }
  0x43   :  { %354 = vmatpush3.msra.mxu0 %v88_v14  ;;  %386 = vmatprep.subr.mxu1 %v184_v19 }
  0x44   :  { %355 = vmatprep.subr.mxu0 %v87_v16  ;;  %387 = vmatpush3.msra.mxu1 %v184_v19 }
  0x45   :  { %356 = vmatpush3.msra.mxu0 %v87_v16  ;;  %388 = vmatprep.subr.mxu1 %v183_v21 }
  0x46   :  { %357 = vmatprep.subr.mxu0 %v86_v18  ;;  %389 = vmatpush3.msra.mxu1 %v183_v21 }
  0x47   :  { %358 = vmatpush3.msra.mxu0 %v86_v18  ;;  %390 = vmatprep.subr.mxu1 %v182_v23 }
  0x48   :  { %359 = vmatprep.subr.mxu0 %v85_v20  ;;  %391 = vmatpush3.msra.mxu1 %v182_v23 }
  0x49   :  { %360 = vmatpush3.msra.mxu0 %v85_v20  ;;  %392 = vmatprep.subr.mxu1 %v181_v25 }
  0x4a   :  { %361 = vmatprep.subr.mxu0 %v84_v22  ;;  %393 = vmatpush3.msra.mxu1 %v181_v25 }
  0x4b   :  { %362 = vmatpush3.msra.mxu0 %v84_v22  ;;  %394 = vmatprep.subr.mxu1 %v180_v27 }
  0x4c   :  { %363 = vmatprep.subr.mxu0 %v83_v24  ;;  %395 = vmatpush3.msra.mxu1 %v180_v27 }
  0x4d   :  { %364 = vmatpush3.msra.mxu0 %v83_v24  ;;  %396 = vmatprep.subr.mxu1 %v179_v29 }
  0x4e   :  { %365 = vmatprep.subr.mxu0 %v82_v26  ;;  %397 = vmatpush3.msra.mxu1 %v179_v29 }
  0x4f   :  { %366 = vmatpush3.msra.mxu0 %v82_v26  ;;  %398 = vmatprep.subr.mxu1 %v178_v31 }
  0x50   :  { %367 = vmatprep.subr.mxu0 %v81_v28  ;;  %399 = vmatpush3.msra.mxu1 %v178_v31 }
  0x51   :  { %368 = vmatpush3.msra.mxu0 %v81_v28  ;;  %400 = vmatprep.subr.mxu1 %v177_v32 }
  0x52   :  { %370 = vmatmul.mubr.f32.vlgmr.msra.gmra.mxu0 %v80_v30  ;;  %401 = vmatpush3.msra.mxu1 %v177_v32 }
  0x53   :  { %402 = vmatprep.subr.mxu1 %v176_v33 }
  0x54   :  { %403 = vmatpush3.msra.mxu1 %v176_v33 }
 0x112   :  { %v371_v34 = vpop.f32.mrf.mxu0 }
 0x113   :  { %v173_v37 = vmax.f32 %v371_v34, 0.0 }
 0x114   :  { %v163_v35 = vpop.f32.mrf.mxu0 }
 0x115   :  { %v172_v36 = vmax.f32 %v163_v35, 0.0 }
 0x117   :  { %404 = vmatprep.mubr.f32.mxu1 %v172_v36 }
 0x118   :  { %405 = vmatmul.mubr.f32.vlgmr.msra.gmra.mxu1 %v173_v37 }
 0x1d8   :  { %v406_v39 = vpop.f32.mrf.mxu1 }
 0x1d9   :  { %v279_v41 = vadd.f32 %v406_v39, %v275_v38 }
 0x1da   :  { %v258_v42 = vpop.f32.mrf.mxu1 }
 0x1db   :  { %281 = vst [vmem:[#allocation11 + $0x8] sm:$0xff] %v279_v41  ;;  %v278_v43 = vadd.f32 %v274_v40, %v258_v42 }
 0x1dd   :  { %280 = vst [vmem:[#allocation11] sm:$0xff] %v278_v43 }
 0x1de   :  { %505 = shalt.err (!%p502_p10)
}
 0x1df   :  { %293 = dma.vmem_to_hbm [thread:$0]  %s288_s3, 256, %s588_s4, [#allocation5], %s524_s20, %s524_s20, %s525_s21  }
 0x1e0   :  { %520 = dma.done.wait [#allocation5], 256  }
 0x1e1   :  { %521 = vsyncadd [#allocation5], 4294967040 }
 0x1e2   :  { %297 = vsyncpa [#allocation4], 1 }
 0x1e3   :  { %298 = vsyncpa [#allocation7], 1 }
 0x1e4   :  { %299 = vsyncpa [#allocation10], 1 }
 0x1e5   :  { %300 = vsyncpa [#allocation5], 1 }

</bundles_post_ra>
